<compile_context>
chip_gen: v5e
topology: v5e:2x2
jax: 0.10.0
libtpu: 0.0.40
codegen_flags: <defaults>
</compile_context>

<pallas_src>
import functools

import jax
import jax.numpy as jnp
from jax.experimental import pallas as pl
from jax.experimental.pallas import tpu as pltpu


# ---------------------------------------------------------------------------
# Helpers
# ---------------------------------------------------------------------------
_WEIGHT_RESIDENCY_BUDGET_BYTES = 24 << 20  # per-buffer fused-weight target (fits v7x 64 MiB)


def _cdiv(a: int, b: int) -> int:
    return -(-a // b)


def _round_up(x: int, m: int) -> int:
    return _cdiv(x, m) * m


def _pick_batch_tile(batch: int) -> int:
    """Batch tile for a cdiv grid with a masked ragged last block.

    Targets >= 2 grid steps (so v7x megacore actually shards the batch axis)
    while capping at 256 rows per tile (good DMA efficiency, bounded f32 gate
    slab on v5e's smaller scoped VMEM).
    """
    if batch <= 8:
        return batch                       # single tiny block, nothing to split
    return min(256, _round_up(_cdiv(batch, 2), 8))


def _pick_hidden_tiles(hidden_dim: int, embedding_dim: int, w_itemsize: int) -> int:
    """Number of hidden(-output) tiles so one fused-weight block fits the budget."""
    full_bytes = (hidden_dim + embedding_dim) * 4 * hidden_dim * w_itemsize
    n = 1
    while full_bytes // n > _WEIGHT_RESIDENCY_BUDGET_BYTES:
        nxt = n * 2
        if hidden_dim % nxt != 0 or (hidden_dim // nxt) % 128 != 0:
            # TODO(synk): pad H to a multiple of 256 to allow deeper, lane-aligned
            # hidden tiling for ragged hidden dims.
            break
        n = nxt
    return n


# ---------------------------------------------------------------------------
# Kernel
# ---------------------------------------------------------------------------
def lstm_cell_kernel(h_ref, c_ref, x_ref, wh_ref, wx_ref, b_ref,
                     h_out_ref, c_out_ref):
    """One (hidden_tile, batch_tile) block of the LSTM cell.

    h_ref : [tb, H]      previous hidden (full hidden width)
    c_ref : [tb, tn]     previous cell state (this hidden tile)
    x_ref : [tb, E]      current input
    wh_ref: [H, 4*tn]    fused gate weights, hidden rows, cols = (gate, col)
    wx_ref: [E, 4*tn]    fused gate weights, input rows,  cols = (gate, col)
    b_ref : [1, 4*tn]    fused gate bias (f32)
    """
    tn = h_out_ref.shape[-1]

    # Cast activations to the weight dtype (bf16 by default) so the MXU gets
    # matched narrow operands; accumulate in f32.
    h = h_ref[...].astype(wh_ref.dtype)
    x = x_ref[...].astype(wx_ref.dtype)

    # One lane-dense [tb, 4*tn] gate slab:
    #   h @ W_h + x @ W_x  ==  concat(h, x) @ concat_rows(W_h, W_x)
    gates = (jnp.dot(h, wh_ref[...], preferred_element_type=jnp.float32)
             + jnp.dot(x, wx_ref[...], preferred_element_type=jnp.float32)
             + b_ref[...].astype(jnp.float32))

    # Gate order inside a tile: forget, input, candidate, output.
    # (Slices are lane-aligned whenever tn is a multiple of 128.)
    f_t = jax.nn.sigmoid(gates[:, 0 * tn:1 * tn])
    i_t = jax.nn.sigmoid(gates[:, 1 * tn:2 * tn])
    g_t = jnp.tanh(gates[:, 2 * tn:3 * tn])
    o_t = jax.nn.sigmoid(gates[:, 3 * tn:4 * tn])

    c_prev = c_ref[...].astype(jnp.float32)
    c_t = f_t * c_prev + i_t * g_t
    h_t = o_t * jnp.tanh(c_t)

    # Single f32 -> output-dtype cast at the stores.
    h_out_ref[...] = h_t.astype(h_out_ref.dtype)
    c_out_ref[...] = c_t.astype(c_out_ref.dtype)


# ---------------------------------------------------------------------------
# Wrapper
# ---------------------------------------------------------------------------
@functools.partial(jax.jit, static_argnames=("n_h_tiles",))
def lstm_cell(prev_hidden, prev_memory, cur_input, params, n_h_tiles=None):
    """One LSTM step. Returns (h_t, c_t), each [B, H].

    `params` must come from `init_params` (packed fused layout).  If params were
    built with an explicit `n_h_tiles`, pass the same value here.
    """
    w_h, w_x, b = params
    B, H = prev_hidden.shape
    E = cur_input.shape[1]

    w_itemsize = jnp.dtype(w_h.dtype).itemsize
    act_itemsize = jnp.dtype(prev_hidden.dtype).itemsize

    if n_h_tiles is None:
        n_h_tiles = _pick_hidden_tiles(H, E, w_itemsize)
    assert H % n_h_tiles == 0, "hidden_dim must be divisible by n_h_tiles"
    tn = H // n_h_tiles

    tb = _pick_batch_tile(B)
    n_b_tiles = _cdiv(B, tb)
    # Hidden tiles OUTER, batch tiles INNER: the weight block index only changes
    # when the (outer) hidden index advances, so each weight block is DMA'd once.
    grid = (n_h_tiles, n_b_tiles)

    # --- VMEM budget (real itemsizes + in-kernel f32 gate slab, clamped) ----
    w_block_bytes = (H + E) * 4 * tn * w_itemsize + 4 * tn * 4      # + f32 bias row
    single_buffer_weights = (n_h_tiles == 1) and (w_block_bytes >= (4 << 20))
    w_buffers = 1 if single_buffer_weights else 2
    act_block_bytes = tb * (H + tn + E + 2 * tn) * act_itemsize     # h,c,x in + h,c out
    gate_tmp_bytes = tb * 4 * tn * 4 * 2                            # f32 slab + gate slices
    vmem_est = (w_buffers * w_block_bytes + 2 * act_block_bytes
                + gate_tmp_bytes + (2 << 20))
    try:
        vmem_cap = int(pltpu.get_tpu_info().vmem_capacity_bytes)
    except Exception:
        vmem_cap = 64 << 20                                          # v7x physical VMEM
    vmem_limit = int(min(max(vmem_est, 32 << 20), vmem_cap - (2 << 20)))

    # --- BlockSpecs ----------------------------------------------------------
    h_spec = pl.BlockSpec((tb, H), lambda hj, bi: (bi, 0))
    c_spec = pl.BlockSpec((tb, tn), lambda hj, bi: (bi, hj))
    x_spec = pl.BlockSpec((tb, E), lambda hj, bi: (bi, 0))

    def _weight_spec(shape):
        # Single-buffer big constant-index weight blocks: they are never
        # re-fetched, so the 2nd pipeline buffer is pure VMEM waste (matters on
        # v7x's 64 MiB VMEM).  Tiny weights keep the default double buffering.
        if single_buffer_weights:
            try:
                return pl.BlockSpec(shape, lambda hj, bi: (0, hj),
                                    pipeline_mode=pl.Buffered(1))
            except Exception:
                pass  # older Pallas without pipeline_mode support
        return pl.BlockSpec(shape, lambda hj, bi: (0, hj))

    wh_spec = _weight_spec((H, 4 * tn))
    wx_spec = _weight_spec((E, 4 * tn))
    b_spec = _weight_spec((1, 4 * tn))

    out_shape = (jax.ShapeDtypeStruct((B, H), prev_hidden.dtype),
                 jax.ShapeDtypeStruct((B, H), prev_memory.dtype))
    out_specs = (pl.BlockSpec((tb, tn), lambda hj, bi: (bi, hj)),
                 pl.BlockSpec((tb, tn), lambda hj, bi: (bi, hj)))

    # prev_memory -> c_out is always safe (block read/written at the same grid
    # step).  prev_hidden -> h_out is only safe when the hidden dim is untiled,
    # because the full-width h input block is re-read for every hidden tile.
    aliases = {1: 1} if n_h_tiles > 1 else {0: 0, 1: 1}

    h_t, c_t = pl.pallas_call(
        lstm_cell_kernel,
        grid=grid,
        in_specs=[h_spec, c_spec, x_spec, wh_spec, wx_spec, b_spec],
        out_specs=out_specs,
        out_shape=out_shape,
        input_output_aliases=aliases,
        compiler_params=pltpu.CompilerParams(
            dimension_semantics=("parallel", "parallel"),
            vmem_limit_bytes=vmem_limit,
        ),
    )(prev_hidden, prev_memory, cur_input, w_h, w_x, b)
    return h_t, c_t


# ---------------------------------------------------------------------------
# Parameters (packed fused layout) + pure-JAX reference
# ---------------------------------------------------------------------------
def init_params(key, hidden_dim, embedding_dim, dtype=jnp.bfloat16, n_h_tiles=None):
    """Mimics nn.Linear default init per gate (U(-k, k), k = 1/sqrt(fan_in)),
    then packs the four gates into one fused weight whose columns are ordered
    (hidden_tile, gate, col), split row-wise into:
      w_h: [H, 4H], w_x: [E, 4H], b: [1, 4H]   (gate order within a tile: f, i, g, o)
    Weights default to bfloat16 (halves HBM weight traffic); bias stays f32.
    For peak TPU performance make hidden_dim a multiple of 128.
    """
    fan_in = hidden_dim + embedding_dim
    if n_h_tiles is None:
        n_h_tiles = _pick_hidden_tiles(hidden_dim, embedding_dim,
                                       jnp.dtype(dtype).itemsize)
    assert hidden_dim % n_h_tiles == 0
    tn = hidden_dim // n_h_tiles

    k = float(1.0 / (fan_in ** 0.5))
    ws, bs = [], []
    for gate in range(4):  # forget, input, candidate, output
        kw, kb = jax.random.split(jax.random.fold_in(key, gate))
        ws.append(jax.random.uniform(kw, (fan_in, hidden_dim), jnp.float32, -k, k))
        bs.append(jax.random.uniform(kb, (1, hidden_dim), jnp.float32, -k, k))
    w4 = jnp.stack(ws, axis=1)                                   # [K, 4, H]
    b4 = jnp.stack(bs, axis=1)                                   # [1, 4, H]
    # column order (hidden_tile, gate, col): [K,4,H] -> [K,4,n,tn] -> [K,n,4,tn] -> [K,4H]
    w_packed = (w4.reshape(fan_in, 4, n_h_tiles, tn)
                  .transpose(0, 2, 1, 3).reshape(fan_in, 4 * hidden_dim))
    b_packed = (b4.reshape(1, 4, n_h_tiles, tn)
                  .transpose(0, 2, 1, 3).reshape(1, 4 * hidden_dim))
    w_h = w_packed[:hidden_dim].astype(dtype)                    # [H, 4H]
    w_x = w_packed[hidden_dim:].astype(dtype)                    # [E, 4H]
    return w_h, w_x, b_packed.astype(jnp.float32)


def lstm_cell_reference(prev_hidden, prev_memory, cur_input, params, n_h_tiles=None):
    """Pure-JAX mirror of the PyTorch LSTMCell.forward (packed-weight aware)."""
    w_h, w_x, b = params
    B, H = prev_hidden.shape
    E = cur_input.shape[1]
    if n_h_tiles is None:
        n_h_tiles = _pick_hidden_tiles(H, E, jnp.dtype(w_h.dtype).itemsize)
    tn = H // n_h_tiles

    comb = jnp.concatenate([prev_hidden, cur_input], axis=1).astype(w_h.dtype)
    w = jnp.concatenate([w_h, w_x], axis=0)                      # [H+E, 4H]
    gates = jnp.dot(comb, w, preferred_element_type=jnp.float32,
                    precision=jax.lax.Precision.HIGHEST) + b.astype(jnp.float32)
    g4 = gates.reshape(B, n_h_tiles, 4, tn)                      # (h_tile, gate, col)
    f_t = jax.nn.sigmoid(g4[:, :, 0, :].reshape(B, H))
    i_t = jax.nn.sigmoid(g4[:, :, 1, :].reshape(B, H))
    g_t = jnp.tanh(g4[:, :, 2, :].reshape(B, H))
    o_t = jax.nn.sigmoid(g4[:, :, 3, :].reshape(B, H))
    c_t = f_t * prev_memory.astype(jnp.float32) + i_t * g_t
    h_t = o_t * jnp.tanh(c_t)
    return h_t.astype(prev_hidden.dtype), c_t.astype(prev_memory.dtype)


# ---------------------------------------------------------------------------
# Self-test
# ---------------------------------------------------------------------------
if __name__ == "__main__":
    key = jax.random.PRNGKey(0)

    # --- Config 1: default path (bf16 weights, fully VMEM-resident weight) ---
    B, H, E = 2, 32, 16
    k_h, k_c, k_x, k_p = jax.random.split(key, 4)
    prev_hidden = jax.random.normal(k_h, (B, H), jnp.float32)
    prev_memory = jax.random.normal(k_c, (B, H), jnp.float32)
    cur_input = jax.random.normal(k_x, (B, E), jnp.float32)
    params = init_params(k_p, H, E)                       # bf16 weights (default)

    h_t, c_t = lstm_cell(prev_hidden, prev_memory, cur_input, params)
    jax.block_until_ready((h_t, c_t))
    h_ref, c_ref = lstm_cell_reference(prev_hidden, prev_memory, cur_input, params)
    assert jnp.allclose(h_t, h_ref, atol=1e-4, rtol=1e-4)
    assert jnp.allclose(c_t, c_ref, atol=1e-4, rtol=1e-4)

    # --- Config 2: f32 weights, forced hidden tiling + >=2 batch tiles (ragged) ---
    B2, H2, E2 = 50, 256, 128
    k_h2, k_c2, k_x2, k_p2 = jax.random.split(jax.random.fold_in(key, 1), 4)
    ph2 = jax.random.normal(k_h2, (B2, H2), jnp.float32)
    pc2 = jax.random.normal(k_c2, (B2, H2), jnp.float32)
    cx2 = jax.random.normal(k_x2, (B2, E2), jnp.float32)
    params2 = init_params(k_p2, H2, E2, dtype=jnp.float32, n_h_tiles=2)

    h2, c2 = lstm_cell(ph2, pc2, cx2, params2, n_h_tiles=2)
    jax.block_until_ready((h2, c2))
    h2_ref, c2_ref = lstm_cell_reference(ph2, pc2, cx2, params2, n_h_tiles=2)
    assert jnp.allclose(h2, h2_ref, atol=1e-4, rtol=1e-4)
    assert jnp.allclose(c2, c2_ref, atol=1e-4, rtol=1e-4)

    print("KERNEL_OK")
</pallas_src>

<mosaic_0001>
module attributes {stable_mosaic.version = 11 : i64} {
  func.func @lstm_cell_kernel(%arg0: i32, %arg1: i32, %arg2: memref<2x32xf32, #tpu.memory_space<vmem>>, %arg3: memref<2x32xf32, #tpu.memory_space<vmem>>, %arg4: memref<2x16xf32, #tpu.memory_space<vmem>>, %arg5: memref<32x128xbf16, #tpu.memory_space<vmem>>, %arg6: memref<16x128xbf16, #tpu.memory_space<vmem>>, %arg7: memref<1x128xf32, #tpu.memory_space<vmem>>, %arg8: memref<2x32xf32, #tpu.memory_space<vmem>>, %arg9: memref<2x32xf32, #tpu.memory_space<vmem>>) attributes {dimension_semantics = [#tpu.dimension_semantics<parallel>, #tpu.dimension_semantics<parallel>], iteration_bounds = array<i64: 1, 1>, scalar_prefetch = 0 : i64, scratch_operands = 0 : i64, tpu.core_type = #tpu.core_type<tc>, window_params = [{transform_indices = @transform_0, window_bounds = array<i64: 2, 32>}, {transform_indices = @transform_1, window_bounds = array<i64: 2, 32>}, {transform_indices = @transform_2, window_bounds = array<i64: 2, 16>}, {transform_indices = @transform_3, window_bounds = array<i64: 32, 128>}, {transform_indices = @transform_4, window_bounds = array<i64: 16, 128>}, {transform_indices = @transform_5, window_bounds = array<i64: 1, 128>}, {transform_indices = @transform_6, window_bounds = array<i64: 2, 32>}, {transform_indices = @transform_7, window_bounds = array<i64: 2, 32>}]} {
    %c0 = arith.constant 0 : index
    %c0_0 = arith.constant 0 : index
    %0 = vector.load %arg2[%c0, %c0_0] : memref<2x32xf32, #tpu.memory_space<vmem>>, vector<2x32xf32>
    %1 = arith.truncf %0 : vector<2x32xf32> to vector<2x32xbf16>
    %c0_1 = arith.constant 0 : index
    %c0_2 = arith.constant 0 : index
    %2 = vector.load %arg4[%c0_1, %c0_2] : memref<2x16xf32, #tpu.memory_space<vmem>>, vector<2x16xf32>
    %3 = arith.truncf %2 : vector<2x16xf32> to vector<2x16xbf16>
    %c0_3 = arith.constant 0 : index
    %c0_4 = arith.constant 0 : index
    %4 = vector.load %arg5[%c0_3, %c0_4] : memref<32x128xbf16, #tpu.memory_space<vmem>>, vector<32x128xbf16>
    %cst = arith.constant dense<0.000000e+00> : vector<2x128xf32>
    %5 = tpu.matmul %1, %4, %cst {dimension_numbers = #tpu.dot_dimension_numbers<[1], [0], [0], [1], [0, 0, 1, 1], [], []>} : vector<2x32xbf16>, vector<32x128xbf16>, vector<2x128xf32> -> vector<2x128xf32>
    %c0_5 = arith.constant 0 : index
    %c0_6 = arith.constant 0 : index
    %6 = vector.load %arg6[%c0_5, %c0_6] : memref<16x128xbf16, #tpu.memory_space<vmem>>, vector<16x128xbf16>
    %cst_7 = arith.constant dense<0.000000e+00> : vector<2x128xf32>
    %7 = tpu.matmul %3, %6, %cst_7 {dimension_numbers = #tpu.dot_dimension_numbers<[1], [0], [0], [1], [0, 0, 1, 1], [], []>} : vector<2x16xbf16>, vector<16x128xbf16>, vector<2x128xf32> -> vector<2x128xf32>
    %8 = arith.addf %5, %7 : vector<2x128xf32>
    %c0_8 = arith.constant 0 : index
    %c0_9 = arith.constant 0 : index
    %9 = vector.load %arg7[%c0_8, %c0_9] : memref<1x128xf32, #tpu.memory_space<vmem>>, vector<1x128xf32>
    %10 = vector.broadcast %9 : vector<1x128xf32> to vector<2x128xf32>
    %11 = arith.addf %8, %10 : vector<2x128xf32>
    %12 = vector.extract_strided_slice %11 {offsets = [0, 0], sizes = [2, 32], strides = [1, 1]} : vector<2x128xf32> to vector<2x32xf32>
    %13 = arith.negf %12 : vector<2x32xf32>
    %14 = math.exp %13 : vector<2x32xf32>
    %cst_10 = arith.constant 1.000000e+00 : f32
    %15 = vector.broadcast %cst_10 : f32 to vector<2x32xf32>
    %16 = arith.addf %15, %14 : vector<2x32xf32>
    %17 = arith.divf %15, %16 : vector<2x32xf32>
    %18 = vector.extract_strided_slice %11 {offsets = [0, 32], sizes = [2, 32], strides = [1, 1]} : vector<2x128xf32> to vector<2x32xf32>
    %19 = arith.negf %18 : vector<2x32xf32>
    %20 = math.exp %19 : vector<2x32xf32>
    %cst_11 = arith.constant 1.000000e+00 : f32
    %21 = vector.broadcast %cst_11 : f32 to vector<2x32xf32>
    %22 = arith.addf %21, %20 : vector<2x32xf32>
    %23 = arith.divf %21, %22 : vector<2x32xf32>
    %24 = vector.extract_strided_slice %11 {offsets = [0, 64], sizes = [2, 32], strides = [1, 1]} : vector<2x128xf32> to vector<2x32xf32>
    %25 = math.tanh %24 : vector<2x32xf32>
    %26 = vector.extract_strided_slice %11 {offsets = [0, 96], sizes = [2, 32], strides = [1, 1]} : vector<2x128xf32> to vector<2x32xf32>
    %27 = arith.negf %26 : vector<2x32xf32>
    %28 = math.exp %27 : vector<2x32xf32>
    %cst_12 = arith.constant 1.000000e+00 : f32
    %29 = vector.broadcast %cst_12 : f32 to vector<2x32xf32>
    %30 = arith.addf %29, %28 : vector<2x32xf32>
    %31 = arith.divf %29, %30 : vector<2x32xf32>
    %c0_13 = arith.constant 0 : index
    %c0_14 = arith.constant 0 : index
    %32 = vector.load %arg3[%c0_13, %c0_14] : memref<2x32xf32, #tpu.memory_space<vmem>>, vector<2x32xf32>
    %33 = arith.mulf %17, %32 : vector<2x32xf32>
    %34 = arith.mulf %23, %25 : vector<2x32xf32>
    %35 = arith.addf %33, %34 : vector<2x32xf32>
    %36 = math.tanh %35 : vector<2x32xf32>
    %37 = arith.mulf %31, %36 : vector<2x32xf32>
    %c0_15 = arith.constant 0 : index
    %c0_16 = arith.constant 0 : index
    %38 = vector.load %arg8[%c0_15, %c0_16] : memref<2x32xf32, #tpu.memory_space<vmem>>, vector<2x32xf32>
    tpu.vector_store %arg8[%c0_15, %c0_16], %37 {strides = array<i32>} : memref<2x32xf32, #tpu.memory_space<vmem>>, vector<2x32xf32>,
    %c0_17 = arith.constant 0 : index
    %c0_18 = arith.constant 0 : index
    %39 = vector.load %arg9[%c0_17, %c0_18] : memref<2x32xf32, #tpu.memory_space<vmem>>, vector<2x32xf32>
    tpu.vector_store %arg9[%c0_17, %c0_18], %35 {strides = array<i32>} : memref<2x32xf32, #tpu.memory_space<vmem>>, vector<2x32xf32>,
    return
  }
  func.func @transform_0(%arg0: i32, %arg1: i32) -> (i32, i32) {
    %c0_i32 = arith.constant 0 : i32
    %c0_i32_0 = arith.constant 0 : i32
    return %arg1, %c0_i32 : i32, i32
  }
  func.func @transform_1(%arg0: i32, %arg1: i32) -> (i32, i32) {
    %c0_i32 = arith.constant 0 : i32
    return %arg1, %arg0 : i32, i32
  }
  func.func @transform_2(%arg0: i32, %arg1: i32) -> (i32, i32) {
    %c0_i32 = arith.constant 0 : i32
    %c0_i32_0 = arith.constant 0 : i32
    return %arg1, %c0_i32 : i32, i32
  }
  func.func @transform_3(%arg0: i32, %arg1: i32) -> (i32, i32) {
    %c0_i32 = arith.constant 0 : i32
    %c0_i32_0 = arith.constant 0 : i32
    return %c0_i32, %arg0 : i32, i32
  }
  func.func @transform_4(%arg0: i32, %arg1: i32) -> (i32, i32) {
    %c0_i32 = arith.constant 0 : i32
    %c0_i32_0 = arith.constant 0 : i32
    return %c0_i32, %arg0 : i32, i32
  }
  func.func @transform_5(%arg0: i32, %arg1: i32) -> (i32, i32) {
    %c0_i32 = arith.constant 0 : i32
    %c0_i32_0 = arith.constant 0 : i32
    return %c0_i32, %arg0 : i32, i32
  }
  func.func @transform_6(%arg0: i32, %arg1: i32) -> (i32, i32) {
    %c0_i32 = arith.constant 0 : i32
    return %arg1, %arg0 : i32, i32
  }
  func.func @transform_7(%arg0: i32, %arg1: i32) -> (i32, i32) {
    %c0_i32 = arith.constant 0 : i32
    return %arg1, %arg0 : i32, i32
  }
}

</mosaic_0001>

<bundles_post_ra>
// kernel: lstm_cell.1
= control target key start
LH: loop header
LB: loop body
LE: loop exit
PB: predicated region body
PF: predicated region fallthrough
CT: control target
= control target key end

     0   :  { %13 = vsyncpa [#allocation3], 0  ;;  %s504_s0 = inlined_call_operand.hbm [shape: f32[2,32], index: 0, kind: input, shape index: {}, may-alias: {0,6}]   ;;  %s505_s1 = inlined_call_operand.hbm [shape: f32[2,32], index: 1, kind: input, shape index: {}, may-alias: {1,7}]   ;;  %s506_s2 = inlined_call_operand.vmem [shape: f32[2,16], index: 2, kind: input, shape index: {}]   ;;  %s507_s3 = inlined_call_operand.hbm [shape: bf16[32,128], index: 3, kind: input, shape index: {}]   ;;  %s508_s4 = inlined_call_operand.hbm [shape: bf16[16,128], index: 4, kind: input, shape index: {}]   ;;  %s509_s5 = inlined_call_operand.vmem [shape: f32[1,128], index: 5, kind: input, shape index: {}]   ;;  %s510_s6 = inlined_call_operand.hbm [shape: f32[2,32], index: 6, kind: output, shape index: {0}, may-alias: {0,6}]   ;;  %s511_s7 = inlined_call_operand.hbm [shape: f32[2,32], index: 7, kind: output, shape index: {1}, may-alias: {1,7}]  }
   0x1   :  { %14 = vsyncpa [#allocation6], 0 }
   0x2   :  { %15 = vsyncpa [#allocation9], 0 }
   0x3   :  { %16 = vsyncpa [#allocation4], 0  ;;  %s34_s26 = sshll.u32 %s505_s1, 4  ;;  %s35_s26 = int_to_ptr.hbm [resolvable:$true] %s34_s26 }
   0x4   :  { %17 = vsyncpa [#allocation12], 0  ;;  %s425_s27 = smov [#allocation5]   ;;  %s23_s8 = sshll.u32 %s504_s0, 4  ;;  %s24_s8 = int_to_ptr.hbm [resolvable:$true] %s23_s8 }
   0x5   :  { %s36_s28 = sshll.u32 %s425_s27, 4  ;;  %s426_s9 = smov [#allocation2]   ;;  %s37_s28 = int_to_ptr.vmem [resolvable:$true] %s36_s28 }
   0x6   :  { %39 = dma.hbm_to_vmem [thread:$0]  %s35_s26, 32, %s37_s28, [#allocation6]  }
   0x7   :  { %s25_s10 = sshll.u32 %s426_s9, 4  ;;  %s46_s13 = sshll.u32 %s507_s3, 4  ;;  %s26_s10 = int_to_ptr.vmem [resolvable:$true] %s25_s10  ;;  %s47_s13 = int_to_ptr.hbm [resolvable:$true] %s46_s13 }
   0x8   :  { %28 = dma.hbm_to_vmem [thread:$0]  %s24_s8, 32, %s26_s10, [#allocation3]  }
   0x9   :  { %s427_s1 = smov [#allocation7]   ;;  %s59_s17 = sshll.u32 %s508_s4, 4  ;;  %s60_s17 = int_to_ptr.hbm [resolvable:$true] %s59_s17 }
   0xa   :  { %s48_s14 = sshll.u32 %s427_s1, 4  ;;  %s428_s18 = smov 64   ;;  %s49_s14 = int_to_ptr.vmem [resolvable:$true] %s48_s14 }
   0xb   :  { %s429_s0 = smov 4   ;;  %s430_s19 = smov [#allocation8]  }
   0xc   :  { %54 = dma.hbm_to_vmem [thread:$0]  %s47_s13, 256, %s49_s14, [#allocation6], %s428_s18, %s428_s18, %s429_s0  }
   0xd   :  { %s61_s20 = sshll.u32 %s430_s19, 4  ;;  %s62_s20 = int_to_ptr.vmem [resolvable:$true] %s61_s20 }
   0xe   :  { %67 = dma.hbm_to_vmem [thread:$0]  %s60_s17, 128, %s62_s20, [#allocation9], %s428_s18, %s428_s18, %s429_s0  }
   0xf   :  { %415 = dma.done.wait [#allocation3], 32  }
  0x10   :  { %416 = vsyncadd [#allocation3], 4294967264 }
  0x11   :  { %417 = dma.done.wait [#allocation6], 288  }
  0x12   :  { %418 = vsyncadd [#allocation6], 4294967008 }
  0x13   :  { %419 = dma.done.wait [#allocation9], 128  }
  0x14   :  { %420 = vsyncadd [#allocation9], 4294967168  ;;  %v251_v0 = vld [vmem:[#allocation8] sm:$0xff]  ;;  %v250_v1 = vld [vmem:[#allocation7 + $0x8] sm:$0xff]  ;;  %vm103_vm0 = vcmask 130048   ;;  %vm132_vm1 = vcmask 261120  }
  0x15   :  { %v89_v2 = vld [vmem:[%s506_s2] sm:$0x3]  ;;  %114 = vmatpush.bf16.msra.mxu0 %v251_v0  ;;  %142 = vmatpush.bf16.msra.mxu1 %v250_v1  ;;  %v249_v4 = vld [vmem:[#allocation7] sm:$0xff]  ;;  %s431_s2 = smov 96   ;;  %v174_v30 = vld [vmem:[#allocation5] sm:$0x3] }
  0x16   :  { %v90_v3 = vpack.c.bf16 %v89_v2, %v89_v2  ;;  %v87_v5 = vld [vmem:[#allocation2] sm:$0x3]  ;;  %vm196_vm6 = vcmask 254976   ;;  %s217_s26 = sshll.u32 %s511_s7, 4  ;;  %s433_s27 = smov 32   ;;  %s218_s26 = int_to_ptr.hbm [resolvable:$true] %s217_s26 }
  0x17   :  { %v88_v6 = vpack.c.bf16 %v87_v5, %v87_v5  ;;  %v262_v8 = vld [vmem:[%s509_s5] ss:$0 sm:$0xff]  ;;  %s432_s5 = smov [#allocation11]   ;;  %s434_s28 = smov [#allocation10]  }
  0x18   :  { %238 = vmatmul.msk.bf16.vlgmr.msra.gmra.mxu0 %vm103_vm0, %v90_v3  ;;  %s215_s23 = sshll.u32 %s432_s5, 4  ;;  %s204_s29 = sshll.u32 %s434_s28, 4  ;;  %s216_s23 = int_to_ptr.vmem [resolvable:$true] %s215_s23  ;;  %s205_s29 = int_to_ptr.vmem [resolvable:$true] %s204_s29 }
  0x19   :  { %143 = vmatpush.bf16.msra.mxu1 %v249_v4  ;;  %s206_s9 = sshll.u32 %s510_s6, 4  ;;  %s207_s9 = int_to_ptr.hbm [resolvable:$true] %s206_s9 }
  0x1c   :  { %247 = vmatmul.msk.bf16.vlgmr.msra.gmra.mxu1 %vm132_vm1, %v88_v6 }
  0x95   :  { %v116_v7 = vpop.f32.mrf.mxu0 }
  0x99   :  { %v145_v9 = vpop.f32.mrf.mxu1 }
  0x9a   :  { %v146_v10 = vadd.f32 %v145_v9, %v116_v7 }
  0x9c   :  { %v153_v11 = vadd.f32 %v262_v8, %v146_v10 }
  0x9d   :  { %v118_v12 = vpop.f32.mrf.mxu0 }
  0x9e   :  { %263 = vtanh.f32 %v153_v11  ;;  %v248_v15 = vmul.f32 -1.442695, %v153_v11 }
  0xa0   :  { %265 = vpow2.f32 %v248_v15 }
  0xa1   :  { %v147_v13 = vpop.f32.mrf.mxu1 }
  0xa4   :  { %v264_v14 = vpop.eup %263 }
  0xa5   :  { %177 = vrot.lane.b32.xlu0 %v264_v14, %s431_s2 }
  0xa6   :  { %v266_v16 = vpop.eup %265 }
  0xa7   :  { %v157_v17 = vadd.f32 1.0, %v266_v16 }
  0xa9   :  { %267 = vrcp.f32 %v157_v17  ;;  %v169_v23 = vand.u32 2147483648, %v157_v17  ;;  %vm163_vm3 = vweird.f32 %v157_v17  ;;  %v167_v24 = vand.u32 2147483647, %v157_v17 }
  0xab   :  { %v170_v26 = vor.u32 1.1754944e-38, %v169_v23  ;;  %vm168_vm5 = vcmp.eq.f32.partialorder %v167_v24, 8.507059e+37 }
  0xaf   :  { %v268_v18 = vpop.eup %267 }
  0xb0   :  { %v159_v19 = vmul.f32 %v268_v18, %v157_v17  ;;  %vm164_vm2 = vweird.f32 %v268_v18 }
  0xb1   :  { %vm165_vm4 = vmor %vm163_vm3, %vm164_vm2 }
  0xb2   :  { %v160_v20 = vsub.f32 1.0, %v159_v19 }
  0xb4   :  { %v161_v21 = vmul.f32 %v268_v18, %v160_v20 }
  0xb6   :  { %v162_v22 = vadd.f32 %v268_v18, %v161_v21 }
  0xb8   :  { %v166_v25 = vsel %vm165_vm4, %v268_v18, %v162_v22 }
  0xb9   :  { %v171_v28 = vsel %vm168_vm5, %v170_v26, %v166_v25 }
  0xba   :  { %v175_v31 = vmul.f32 %v174_v30, %v171_v28 }
 0x117   :  { %v178_v27 = vpop.permute.xlu0 %177 }
 0x118   :  { %v180_v29 = vmul.f32 %v178_v27, %v171_v28 }
 0x11a   :  { %182 = vrot.lane.b32.xlu0 %v180_v29, %s431_s2 }
 0x18c   :  { %v183_v32 = vpop.permute.xlu0 %182 }
 0x18d   :  { %v185_v33 = vadd.f32 %v183_v32, %v175_v31 }
 0x18f   :  { %269 = vtanh.f32 %v185_v33  ;;  %198 = vst.msk [vmem:[#allocation11] sm:$0x3] %vm196_vm6, %v185_v33 }
 0x190   :  { %220 = dma.vmem_to_hbm [thread:$0]  %s216_s23, 32, %s218_s26, [#allocation12]  }
 0x195   :  { %v270_v34 = vpop.eup %269 }
 0x196   :  { %188 = vrot.lane.b32.xlu1 %v270_v34, %s431_s2 }
 0x208   :  { %v189_v35 = vpop.permute.xlu1 %188 }
 0x209   :  { %v191_v36 = vmul.f32 %v189_v35, %v171_v28 }
 0x20b   :  { %193 = vrot.lane.b32.xlu1 %v191_v36, %s433_s27 }
 0x27d   :  { %v194_v37 = vpop.permute.xlu1 %193 }
 0x27e   :  { %197 = vst.msk [vmem:[#allocation10] sm:$0x3] %vm196_vm6, %v194_v37 }
 0x27f   :  { %209 = dma.vmem_to_hbm [thread:$0]  %s205_s29, 32, %s207_s9, [#allocation4]  }
 0x280   :  { %421 = dma.done.wait [#allocation4], 32  }
 0x281   :  { %422 = vsyncadd [#allocation4], 4294967264 }
 0x282   :  { %423 = dma.done.wait [#allocation12], 32  }
 0x283   :  { %424 = vsyncadd [#allocation12], 4294967264 }
 0x284   :  { %229 = vsyncpa [#allocation3], 1 }
 0x285   :  { %230 = vsyncpa [#allocation6], 1 }
 0x286   :  { %231 = vsyncpa [#allocation9], 1 }
 0x287   :  { %232 = vsyncpa [#allocation4], 1 }
 0x288   :  { %233 = vsyncpa [#allocation12], 1 }

</bundles_post_ra>
